<compile_context>
chip_gen: v7x
topology: tpu7x:2x2x1
jax: 0.10.0
libtpu: 0.0.40
codegen_flags: <defaults>
</compile_context>

<pallas_src>
import jax
import jax.numpy as jnp
from jax import lax
from jax.experimental import pallas as pl
from jax.experimental.pallas import tpu as pltpu


def _downsample_kernel(ee0_ref, ee0b_ref, eo_ref, eob_ref, ee1_ref, ee1b_ref,
                       oe0_ref, oo_ref, oe1_ref, w_ref, b_ref,
                       o_ref, acc_ref):
    """One (batch, row-tile) step of reflection-pad + 3x3 / stride-2 conv.

    Block shapes (T = output rows per tile, Wp = width padded to 8):
      ee0/eo/ee1    : (1, T*Wp, C)  even-input-row tap planes (kw = 0, 1, 2)
      ee0b/eob/ee1b : (1, Wp,   C)  their single boundary row (next even row)
      oe0/oo/oe1    : (1, T*Wp, C)  odd-input-row tap planes  (kw = 0, 1, 2)
      w_ref         : (9, C, Co)    tap-major weights, channels-last
      b_ref         : (1, Co)       bias (f32)
      o_ref         : (1, T*Wp, Co) output tile (lane-dense, channels-last)
      acc_ref       : (T*Wp, Co)    f32 scratch accumulator
    """
    TW, Co = acc_ref.shape
    Wp = ee0b_ref.shape[1]

    def tap(x, k):
        # One full-size MXU matmul per tap: (rows, C) @ (C, Co), f32 accum.
        return jnp.dot(x, w_ref[k], preferred_element_type=jnp.float32)

    ee0, eo, ee1 = ee0_ref[0], eo_ref[0], ee1_ref[0]
    oe0, oo, oe1 = oe0_ref[0], oo_ref[0], oe1_ref[0]

    # kh = 0 (even input rows) and kh = 1 (odd input rows): plane rows line up
    # 1:1 with the tile's output rows.  Bias is folded into the accumulator
    # init (no separate broadcast-add at the end).
    acc = jnp.broadcast_to(b_ref[...], (TW, Co)).astype(jnp.float32)
    acc = acc + tap(ee0, 0) + tap(eo, 1) + tap(ee1, 2)
    acc = acc + tap(oe0, 3) + tap(oo, 4) + tap(oe1, 5)
    acc_ref[...] = acc

    # kh = 2 (even input rows shifted down by one output row): plane rows
    # 1..T-1 of the main block feed output rows 0..T-2; the boundary row (the
    # first even row of the next tile) feeds output row T-1.  Both updates are
    # contiguous, sublane-aligned slice-accumulates -- no concatenation.
    if TW > Wp:                               # static; false only when T == 1
        acc_ref[0:TW - Wp, :] += (tap(ee0[Wp:], 6) + tap(eo[Wp:], 7)
                                  + tap(ee1[Wp:], 8))
    acc_ref[TW - Wp:TW, :] += (tap(ee0b_ref[0], 6) + tap(eob_ref[0], 7)
                               + tap(ee1b_ref[0], 8))

    o_ref[0] = acc_ref[...].astype(o_ref.dtype)


def _pick_tile_rows(ho, wp, c, co, in_itemsize, out_itemsize, n_batch,
                    budget_bytes):
    """Largest output-row tile whose true per-step VMEM footprint (inputs and
    outputs double-buffered, f32 scratch single-buffered) fits the budget,
    capped so the grid has >= 2 steps (keeps both v7x TensorCores busy)."""
    def footprint(t):
        tw = t * wp
        inp = 6 * tw * c + 3 * wp * c          # 6 main planes + 3 boundary rows
        wgt = 9 * c * co + co
        out = tw * co
        acc = tw * co * 4
        return 2 * in_itemsize * (inp + wgt) + 2 * out_itemsize * out + acc

    t = 1
    for cand in range(1, ho + 1):
        if footprint(cand) > budget_bytes:
            break
        t = cand
    if ho >= 2 and n_batch * ((ho + t - 1) // t) < 2:
        t = (ho + 1) // 2                      # force >= 2 row tiles when N == 1
    return t


def downsample_forward(x_nchw, w_oihw, bias, *, compute_dtype=None,
                       vmem_budget_bytes=8 * 1024 * 1024):
    """ReflectionPad2d(1) + Conv2d(C, Co, 3, stride=2) forward (NCHW)."""
    N, C, H, W = x_nchw.shape
    Co = w_oihw.shape[0]
    assert w_oihw.shape == (Co, C, 3, 3)
    assert H >= 2 and W >= 2, "ReflectionPad2d(1) needs spatial dims >= 2"

    Ho = (H - 1) // 2 + 1                      # PyTorch conv output size
    Wo = (W - 1) // 2 + 1
    Wp = -(-Wo // 8) * 8                       # width padded to a sublane multiple

    dt = jnp.dtype(compute_dtype) if compute_dtype is not None else x_nchw.dtype

    T = _pick_tile_rows(Ho, Wp, C, Co, jnp.dtype(dt).itemsize,
                        jnp.dtype(x_nchw.dtype).itemsize, N, vmem_budget_bytes)
    n_row_tiles = -(-Ho // T)
    Ho_pad = n_row_tiles * T

    # ---- glue: reflection pad + stride-2 tap-plane split (fused XLA pass) ---
    xp = jnp.pad(x_nchw, ((0, 0), (0, 0), (1, 1), (1, 1)), mode="reflect")

    def plane(ph, pw, rows, tgt_rows):
        # Tap plane: padded-input pixel (2r+ph, 2j+pw) for output (r, j),
        # channels last, width padded to Wp, rows padded to tgt_rows, then
        # flattened so each kernel block is directly a 2-D matmul operand.
        p = jnp.transpose(xp[:, :, ph::2, pw::2], (0, 2, 3, 1))   # (N,r,c,C)
        p = p[:, :rows, :Wo, :]
        p = jnp.pad(p, ((0, 0), (0, tgt_rows - rows), (0, Wp - Wo), (0, 0)))
        return p.reshape(N, tgt_rows * Wp, C).astype(dt)

    ee0 = plane(0, 0, Ho + 1, Ho_pad + 1)      # kh in {0,2}, kw = 0
    eo = plane(0, 1, Ho + 1, Ho_pad + 1)       # kh in {0,2}, kw = 1
    ee1 = plane(0, 2, Ho + 1, Ho_pad + 1)      # kh in {0,2}, kw = 2
    oe0 = plane(1, 0, Ho, Ho_pad)              # kh = 1,      kw = 0
    oo = plane(1, 1, Ho, Ho_pad)               # kh = 1,      kw = 1
    oe1 = plane(1, 2, Ho, Ho_pad)              # kh = 1,      kw = 2

    # weights: (Co, Ci, kh, kw) -> (kh*3+kw, Ci, Co); bias stays f32.
    w9 = jnp.transpose(w_oihw, (2, 3, 1, 0)).reshape(9, C, Co).astype(dt)
    b2 = bias.reshape(1, Co).astype(jnp.float32)

    main_spec = pl.BlockSpec((1, T * Wp, C), lambda n, t: (n, t, 0))
    bnd_spec = pl.BlockSpec((1, Wp, C), lambda n, t: (n, (t + 1) * T, 0))
    # NOTE: weight/bias blocks are grid-invariant; pipeline_mode=pl.Buffered(1)
    # would skip their second buffer (only matters for very large C*Co on v7x).
    w_spec = pl.BlockSpec((9, C, Co), lambda n, t: (0, 0, 0))
    b_spec = pl.BlockSpec((1, Co), lambda n, t: (0, 0))
    out_spec = pl.BlockSpec((1, T * Wp, Co), lambda n, t: (n, t, 0))

    out_flat = pl.pallas_call(
        _downsample_kernel,
        out_shape=jax.ShapeDtypeStruct((N, Ho_pad * Wp, Co), x_nchw.dtype),
        grid_spec=pltpu.PrefetchScalarGridSpec(
            num_scalar_prefetch=0,
            grid=(N, n_row_tiles),
            in_specs=[main_spec, bnd_spec,              # ee0, ee0 boundary
                      main_spec, bnd_spec,              # eo,  eo  boundary
                      main_spec, bnd_spec,              # ee1, ee1 boundary
                      main_spec, main_spec, main_spec,  # oe0, oo,  oe1
                      w_spec, b_spec],
            out_specs=out_spec,
            scratch_shapes=[pltpu.VMEM((T * Wp, Co), jnp.float32)]),
        compiler_params=pltpu.CompilerParams(
            dimension_semantics=("parallel", "parallel"),
            vmem_limit_bytes=32 * 1024 * 1024),
    )(ee0, ee0, eo, eo, ee1, ee1, oe0, oo, oe1, w9, b2)

    # (N, Ho_pad*Wp, Co) -> (N, Co, Ho, Wo): touches only the 4x-smaller output.
    out = out_flat.reshape(N, Ho_pad, Wp, Co)[:, :Ho, :Wo, :]
    return jnp.transpose(out, (0, 3, 1, 2))


def _reference_forward(x_nchw, w_oihw, bias):
    """Pure-JAX reference (lax.conv) for the correctness check."""
    xp = jnp.pad(x_nchw, ((0, 0), (0, 0), (1, 1), (1, 1)), mode="reflect")
    y = lax.conv_general_dilated(
        xp, w_oihw, window_strides=(2, 2), padding="VALID",
        dimension_numbers=("NCHW", "OIHW", "NCHW"))
    return y + bias.reshape(1, -1, 1, 1)


if __name__ == "__main__":
    features = 4
    N, H, W = 2, 16, 16

    key = jax.random.PRNGKey(0)
    kx, kw, kb = jax.random.split(key, 3)
    x = jax.random.normal(kx, (N, features, H, W), dtype=jnp.float32)
    # Deterministic parameter init (Conv2d weight shape: (Cout, Cin, 3, 3)).
    w = jax.random.normal(kw, (features, features, 3, 3), dtype=jnp.float32) * 0.1
    b = jax.random.normal(kb, (features,), dtype=jnp.float32) * 0.1

    out = jax.block_until_ready(downsample_forward(x, w, b))
    ref = jax.block_until_ready(_reference_forward(x, w, b))

    assert out.shape == (N, features, H // 2, W // 2), out.shape
    assert jnp.allclose(out, ref, atol=1e-4, rtol=1e-4), \
        float(jnp.max(jnp.abs(out - ref)))

    print("KERNEL_OK")
</pallas_src>

<mosaic_0001>
module attributes {stable_mosaic.version = 11 : i64} {
  func.func @_downsample_kernel(%arg0: i32, %arg1: i32, %arg2: memref<1x64x4xf32, #tpu.memory_space<vmem>>, %arg3: memref<1x8x4xf32, #tpu.memory_space<vmem>>, %arg4: memref<1x64x4xf32, #tpu.memory_space<vmem>>, %arg5: memref<1x8x4xf32, #tpu.memory_space<vmem>>, %arg6: memref<1x64x4xf32, #tpu.memory_space<vmem>>, %arg7: memref<1x8x4xf32, #tpu.memory_space<vmem>>, %arg8: memref<1x64x4xf32, #tpu.memory_space<vmem>>, %arg9: memref<1x64x4xf32, #tpu.memory_space<vmem>>, %arg10: memref<1x64x4xf32, #tpu.memory_space<vmem>>, %arg11: memref<9x4x4xf32, #tpu.memory_space<vmem>>, %arg12: memref<1x4xf32, #tpu.memory_space<vmem>>, %arg13: memref<1x64x4xf32, #tpu.memory_space<vmem>>, %arg14: memref<64x4xf32, #tpu.memory_space<vmem>>) attributes {dimension_semantics = [#tpu.dimension_semantics<parallel>, #tpu.dimension_semantics<parallel>], iteration_bounds = array<i64: 2, 1>, scalar_prefetch = 0 : i64, scratch_operands = 1 : i64, tpu.core_type = #tpu.core_type<tc>, window_params = [{transform_indices = @transform_0, window_bounds = array<i64: 1, 64, 4>}, {transform_indices = @transform_1, window_bounds = array<i64: 1, 8, 4>}, {transform_indices = @transform_2, window_bounds = array<i64: 1, 64, 4>}, {transform_indices = @transform_3, window_bounds = array<i64: 1, 8, 4>}, {transform_indices = @transform_4, window_bounds = array<i64: 1, 64, 4>}, {transform_indices = @transform_5, window_bounds = array<i64: 1, 8, 4>}, {transform_indices = @transform_6, window_bounds = array<i64: 1, 64, 4>}, {transform_indices = @transform_7, window_bounds = array<i64: 1, 64, 4>}, {transform_indices = @transform_8, window_bounds = array<i64: 1, 64, 4>}, {pipeline_mode = #tpu.pipeline_mode<synchronous>, transform_indices = @transform_9, window_bounds = array<i64: 9, 4, 4>}, {pipeline_mode = #tpu.pipeline_mode<synchronous>, transform_indices = @transform_10, window_bounds = array<i64: 1, 4>}, {transform_indices = @transform_11, window_bounds = array<i64: 1, 64, 4>}]} {
    %c0 = arith.constant 0 : index
    %c0_0 = arith.constant 0 : index
    %c0_1 = arith.constant 0 : index
    %0 = vector.load %arg2[%c0, %c0_0, %c0_1] : memref<1x64x4xf32, #tpu.memory_space<vmem>>, vector<1x64x4xf32>
    %1 = vector.shape_cast %0 : vector<1x64x4xf32> to vector<64x4xf32>
    %c0_2 = arith.constant 0 : index
    %c0_3 = arith.constant 0 : index
    %c0_4 = arith.constant 0 : index
    %2 = vector.load %arg4[%c0_2, %c0_3, %c0_4] : memref<1x64x4xf32, #tpu.memory_space<vmem>>, vector<1x64x4xf32>
    %3 = vector.shape_cast %2 : vector<1x64x4xf32> to vector<64x4xf32>
    %c0_5 = arith.constant 0 : index
    %c0_6 = arith.constant 0 : index
    %c0_7 = arith.constant 0 : index
    %4 = vector.load %arg6[%c0_5, %c0_6, %c0_7] : memref<1x64x4xf32, #tpu.memory_space<vmem>>, vector<1x64x4xf32>
    %5 = vector.shape_cast %4 : vector<1x64x4xf32> to vector<64x4xf32>
    %c0_8 = arith.constant 0 : index
    %c0_9 = arith.constant 0 : index
    %c0_10 = arith.constant 0 : index
    %6 = vector.load %arg8[%c0_8, %c0_9, %c0_10] : memref<1x64x4xf32, #tpu.memory_space<vmem>>, vector<1x64x4xf32>
    %7 = vector.shape_cast %6 : vector<1x64x4xf32> to vector<64x4xf32>
    %c0_11 = arith.constant 0 : index
    %c0_12 = arith.constant 0 : index
    %c0_13 = arith.constant 0 : index
    %8 = vector.load %arg9[%c0_11, %c0_12, %c0_13] : memref<1x64x4xf32, #tpu.memory_space<vmem>>, vector<1x64x4xf32>
    %9 = vector.shape_cast %8 : vector<1x64x4xf32> to vector<64x4xf32>
    %c0_14 = arith.constant 0 : index
    %c0_15 = arith.constant 0 : index
    %c0_16 = arith.constant 0 : index
    %10 = vector.load %arg10[%c0_14, %c0_15, %c0_16] : memref<1x64x4xf32, #tpu.memory_space<vmem>>, vector<1x64x4xf32>
    %11 = vector.shape_cast %10 : vector<1x64x4xf32> to vector<64x4xf32>
    %c0_17 = arith.constant 0 : index
    %c0_18 = arith.constant 0 : index
    %12 = vector.load %arg12[%c0_17, %c0_18] : memref<1x4xf32, #tpu.memory_space<vmem>>, vector<1x4xf32>
    %13 = vector.shape_cast %12 : vector<1x4xf32> to vector<1x4xf32>
    %14 = vector.broadcast %13 : vector<1x4xf32> to vector<64x4xf32>
    %c0_19 = arith.constant 0 : index
    %c0_20 = arith.constant 0 : index
    %c0_21 = arith.constant 0 : index
    %15 = vector.load %arg11[%c0_19, %c0_20, %c0_21] : memref<9x4x4xf32, #tpu.memory_space<vmem>>, vector<1x4x4xf32>
    %16 = vector.shape_cast %15 : vector<1x4x4xf32> to vector<4x4xf32>
    %cst = arith.constant dense<0.000000e+00> : vector<64x4xf32>
    %17 = tpu.matmul %1, %16, %cst {dimension_numbers = #tpu.dot_dimension_numbers<[1], [0], [0], [1], [0, 0, 1, 1], [], []>} : vector<64x4xf32>, vector<4x4xf32>, vector<64x4xf32> -> vector<64x4xf32>
    %18 = arith.addf %14, %17 : vector<64x4xf32>
    %c1 = arith.constant 1 : index
    %c0_22 = arith.constant 0 : index
    %c0_23 = arith.constant 0 : index
    %19 = vector.load %arg11[%c1, %c0_22, %c0_23] : memref<9x4x4xf32, #tpu.memory_space<vmem>>, vector<1x4x4xf32>
    %20 = vector.shape_cast %19 : vector<1x4x4xf32> to vector<4x4xf32>
    %cst_24 = arith.constant dense<0.000000e+00> : vector<64x4xf32>
    %21 = tpu.matmul %3, %20, %cst_24 {dimension_numbers = #tpu.dot_dimension_numbers<[1], [0], [0], [1], [0, 0, 1, 1], [], []>} : vector<64x4xf32>, vector<4x4xf32>, vector<64x4xf32> -> vector<64x4xf32>
    %22 = arith.addf %18, %21 : vector<64x4xf32>
    %c2 = arith.constant 2 : index
    %c0_25 = arith.constant 0 : index
    %c0_26 = arith.constant 0 : index
    %23 = vector.load %arg11[%c2, %c0_25, %c0_26] : memref<9x4x4xf32, #tpu.memory_space<vmem>>, vector<1x4x4xf32>
    %24 = vector.shape_cast %23 : vector<1x4x4xf32> to vector<4x4xf32>
    %cst_27 = arith.constant dense<0.000000e+00> : vector<64x4xf32>
    %25 = tpu.matmul %5, %24, %cst_27 {dimension_numbers = #tpu.dot_dimension_numbers<[1], [0], [0], [1], [0, 0, 1, 1], [], []>} : vector<64x4xf32>, vector<4x4xf32>, vector<64x4xf32> -> vector<64x4xf32>
    %26 = arith.addf %22, %25 : vector<64x4xf32>
    %c3 = arith.constant 3 : index
    %c0_28 = arith.constant 0 : index
    %c0_29 = arith.constant 0 : index
    %27 = vector.load %arg11[%c3, %c0_28, %c0_29] : memref<9x4x4xf32, #tpu.memory_space<vmem>>, vector<1x4x4xf32>
    %28 = vector.shape_cast %27 : vector<1x4x4xf32> to vector<4x4xf32>
    %cst_30 = arith.constant dense<0.000000e+00> : vector<64x4xf32>
    %29 = tpu.matmul %7, %28, %cst_30 {dimension_numbers = #tpu.dot_dimension_numbers<[1], [0], [0], [1], [0, 0, 1, 1], [], []>} : vector<64x4xf32>, vector<4x4xf32>, vector<64x4xf32> -> vector<64x4xf32>
    %30 = arith.addf %26, %29 : vector<64x4xf32>
    %c4 = arith.constant 4 : index
    %c0_31 = arith.constant 0 : index
    %c0_32 = arith.constant 0 : index
    %31 = vector.load %arg11[%c4, %c0_31, %c0_32] : memref<9x4x4xf32, #tpu.memory_space<vmem>>, vector<1x4x4xf32>
    %32 = vector.shape_cast %31 : vector<1x4x4xf32> to vector<4x4xf32>
    %cst_33 = arith.constant dense<0.000000e+00> : vector<64x4xf32>
    %33 = tpu.matmul %9, %32, %cst_33 {dimension_numbers = #tpu.dot_dimension_numbers<[1], [0], [0], [1], [0, 0, 1, 1], [], []>} : vector<64x4xf32>, vector<4x4xf32>, vector<64x4xf32> -> vector<64x4xf32>
    %34 = arith.addf %30, %33 : vector<64x4xf32>
    %c5 = arith.constant 5 : index
    %c0_34 = arith.constant 0 : index
    %c0_35 = arith.constant 0 : index
    %35 = vector.load %arg11[%c5, %c0_34, %c0_35] : memref<9x4x4xf32, #tpu.memory_space<vmem>>, vector<1x4x4xf32>
    %36 = vector.shape_cast %35 : vector<1x4x4xf32> to vector<4x4xf32>
    %cst_36 = arith.constant dense<0.000000e+00> : vector<64x4xf32>
    %37 = tpu.matmul %11, %36, %cst_36 {dimension_numbers = #tpu.dot_dimension_numbers<[1], [0], [0], [1], [0, 0, 1, 1], [], []>} : vector<64x4xf32>, vector<4x4xf32>, vector<64x4xf32> -> vector<64x4xf32>
    %38 = arith.addf %34, %37 : vector<64x4xf32>
    %c0_37 = arith.constant 0 : index
    %c0_38 = arith.constant 0 : index
    %39 = vector.load %arg14[%c0_37, %c0_38] : memref<64x4xf32, #tpu.memory_space<vmem>>, vector<64x4xf32>
    tpu.vector_store %arg14[%c0_37, %c0_38], %38 {strides = array<i32>} : memref<64x4xf32, #tpu.memory_space<vmem>>, vector<64x4xf32>,
    %c0_39 = arith.constant 0 : index
    %c0_40 = arith.constant 0 : index
    %40 = vector.load %arg14[%c0_39, %c0_40] : memref<64x4xf32, #tpu.memory_space<vmem>>, vector<56x4xf32>
    %41 = vector.extract_strided_slice %1 {offsets = [8, 0], sizes = [56, 4], strides = [1, 1]} : vector<64x4xf32> to vector<56x4xf32>
    %c6 = arith.constant 6 : index
    %c0_41 = arith.constant 0 : index
    %c0_42 = arith.constant 0 : index
    %42 = vector.load %arg11[%c6, %c0_41, %c0_42] : memref<9x4x4xf32, #tpu.memory_space<vmem>>, vector<1x4x4xf32>
    %43 = vector.shape_cast %42 : vector<1x4x4xf32> to vector<4x4xf32>
    %cst_43 = arith.constant dense<0.000000e+00> : vector<56x4xf32>
    %44 = tpu.matmul %41, %43, %cst_43 {dimension_numbers = #tpu.dot_dimension_numbers<[1], [0], [0], [1], [0, 0, 1, 1], [], []>} : vector<56x4xf32>, vector<4x4xf32>, vector<56x4xf32> -> vector<56x4xf32>
    %45 = vector.extract_strided_slice %3 {offsets = [8, 0], sizes = [56, 4], strides = [1, 1]} : vector<64x4xf32> to vector<56x4xf32>
    %c7 = arith.constant 7 : index
    %c0_44 = arith.constant 0 : index
    %c0_45 = arith.constant 0 : index
    %46 = vector.load %arg11[%c7, %c0_44, %c0_45] : memref<9x4x4xf32, #tpu.memory_space<vmem>>, vector<1x4x4xf32>
    %47 = vector.shape_cast %46 : vector<1x4x4xf32> to vector<4x4xf32>
    %cst_46 = arith.constant dense<0.000000e+00> : vector<56x4xf32>
    %48 = tpu.matmul %45, %47, %cst_46 {dimension_numbers = #tpu.dot_dimension_numbers<[1], [0], [0], [1], [0, 0, 1, 1], [], []>} : vector<56x4xf32>, vector<4x4xf32>, vector<56x4xf32> -> vector<56x4xf32>
    %49 = arith.addf %44, %48 : vector<56x4xf32>
    %50 = vector.extract_strided_slice %5 {offsets = [8, 0], sizes = [56, 4], strides = [1, 1]} : vector<64x4xf32> to vector<56x4xf32>
    %c8 = arith.constant 8 : index
    %c0_47 = arith.constant 0 : index
    %c0_48 = arith.constant 0 : index
    %51 = vector.load %arg11[%c8, %c0_47, %c0_48] : memref<9x4x4xf32, #tpu.memory_space<vmem>>, vector<1x4x4xf32>
    %52 = vector.shape_cast %51 : vector<1x4x4xf32> to vector<4x4xf32>
    %cst_49 = arith.constant dense<0.000000e+00> : vector<56x4xf32>
    %53 = tpu.matmul %50, %52, %cst_49 {dimension_numbers = #tpu.dot_dimension_numbers<[1], [0], [0], [1], [0, 0, 1, 1], [], []>} : vector<56x4xf32>, vector<4x4xf32>, vector<56x4xf32> -> vector<56x4xf32>
    %54 = arith.addf %49, %53 : vector<56x4xf32>
    %55 = arith.addf %40, %54 : vector<56x4xf32>
    %c0_50 = arith.constant 0 : index
    %c0_51 = arith.constant 0 : index
    %56 = vector.load %arg14[%c0_50, %c0_51] : memref<64x4xf32, #tpu.memory_space<vmem>>, vector<56x4xf32>
    tpu.vector_store %arg14[%c0_50, %c0_51], %55 {strides = array<i32>} : memref<64x4xf32, #tpu.memory_space<vmem>>, vector<56x4xf32>,
    %c56 = arith.constant 56 : index
    %c0_52 = arith.constant 0 : index
    %57 = vector.load %arg14[%c56, %c0_52] : memref<64x4xf32, #tpu.memory_space<vmem>>, vector<8x4xf32>
    %c0_53 = arith.constant 0 : index
    %c0_54 = arith.constant 0 : index
    %c0_55 = arith.constant 0 : index
    %58 = vector.load %arg3[%c0_53, %c0_54, %c0_55] : memref<1x8x4xf32, #tpu.memory_space<vmem>>, vector<1x8x4xf32>
    %59 = vector.shape_cast %58 : vector<1x8x4xf32> to vector<8x4xf32>
    %c6_56 = arith.constant 6 : index
    %c0_57 = arith.constant 0 : index
    %c0_58 = arith.constant 0 : index
    %60 = vector.load %arg11[%c6_56, %c0_57, %c0_58] : memref<9x4x4xf32, #tpu.memory_space<vmem>>, vector<1x4x4xf32>
    %61 = vector.shape_cast %60 : vector<1x4x4xf32> to vector<4x4xf32>
    %cst_59 = arith.constant dense<0.000000e+00> : vector<8x4xf32>
    %62 = tpu.matmul %59, %61, %cst_59 {dimension_numbers = #tpu.dot_dimension_numbers<[1], [0], [0], [1], [0, 0, 1, 1], [], []>} : vector<8x4xf32>, vector<4x4xf32>, vector<8x4xf32> -> vector<8x4xf32>
    %c0_60 = arith.constant 0 : index
    %c0_61 = arith.constant 0 : index
    %c0_62 = arith.constant 0 : index
    %63 = vector.load %arg5[%c0_60, %c0_61, %c0_62] : memref<1x8x4xf32, #tpu.memory_space<vmem>>, vector<1x8x4xf32>
    %64 = vector.shape_cast %63 : vector<1x8x4xf32> to vector<8x4xf32>
    %c7_63 = arith.constant 7 : index
    %c0_64 = arith.constant 0 : index
    %c0_65 = arith.constant 0 : index
    %65 = vector.load %arg11[%c7_63, %c0_64, %c0_65] : memref<9x4x4xf32, #tpu.memory_space<vmem>>, vector<1x4x4xf32>
    %66 = vector.shape_cast %65 : vector<1x4x4xf32> to vector<4x4xf32>
    %cst_66 = arith.constant dense<0.000000e+00> : vector<8x4xf32>
    %67 = tpu.matmul %64, %66, %cst_66 {dimension_numbers = #tpu.dot_dimension_numbers<[1], [0], [0], [1], [0, 0, 1, 1], [], []>} : vector<8x4xf32>, vector<4x4xf32>, vector<8x4xf32> -> vector<8x4xf32>
    %68 = arith.addf %62, %67 : vector<8x4xf32>
    %c0_67 = arith.constant 0 : index
    %c0_68 = arith.constant 0 : index
    %c0_69 = arith.constant 0 : index
    %69 = vector.load %arg7[%c0_67, %c0_68, %c0_69] : memref<1x8x4xf32, #tpu.memory_space<vmem>>, vector<1x8x4xf32>
    %70 = vector.shape_cast %69 : vector<1x8x4xf32> to vector<8x4xf32>
    %c8_70 = arith.constant 8 : index
    %c0_71 = arith.constant 0 : index
    %c0_72 = arith.constant 0 : index
    %71 = vector.load %arg11[%c8_70, %c0_71, %c0_72] : memref<9x4x4xf32, #tpu.memory_space<vmem>>, vector<1x4x4xf32>
    %72 = vector.shape_cast %71 : vector<1x4x4xf32> to vector<4x4xf32>
    %cst_73 = arith.constant dense<0.000000e+00> : vector<8x4xf32>
    %73 = tpu.matmul %70, %72, %cst_73 {dimension_numbers = #tpu.dot_dimension_numbers<[1], [0], [0], [1], [0, 0, 1, 1], [], []>} : vector<8x4xf32>, vector<4x4xf32>, vector<8x4xf32> -> vector<8x4xf32>
    %74 = arith.addf %68, %73 : vector<8x4xf32>
    %75 = arith.addf %57, %74 : vector<8x4xf32>
    %c56_74 = arith.constant 56 : index
    %c0_75 = arith.constant 0 : index
    %76 = vector.load %arg14[%c56_74, %c0_75] : memref<64x4xf32, #tpu.memory_space<vmem>>, vector<8x4xf32>
    tpu.vector_store %arg14[%c56_74, %c0_75], %75 {strides = array<i32>} : memref<64x4xf32, #tpu.memory_space<vmem>>, vector<8x4xf32>,
    %c0_76 = arith.constant 0 : index
    %c0_77 = arith.constant 0 : index
    %77 = vector.load %arg14[%c0_76, %c0_77] : memref<64x4xf32, #tpu.memory_space<vmem>>, vector<64x4xf32>
    %c0_78 = arith.constant 0 : index
    %c0_79 = arith.constant 0 : index
    %c0_80 = arith.constant 0 : index
    %78 = vector.load %arg13[%c0_78, %c0_79, %c0_80] : memref<1x64x4xf32, #tpu.memory_space<vmem>>, vector<1x64x4xf32>
    %79 = vector.shape_cast %78 : vector<1x64x4xf32> to vector<64x4xf32>
    %80 = vector.shape_cast %77 : vector<64x4xf32> to vector<1x64x4xf32>
    tpu.vector_store %arg13[%c0_78, %c0_79, %c0_80], %80 {strides = array<i32>} : memref<1x64x4xf32, #tpu.memory_space<vmem>>, vector<1x64x4xf32>,
    return
  }
  func.func @transform_0(%arg0: i32, %arg1: i32) -> (i32, i32, i32) {
    %c0_i32 = arith.constant 0 : i32
    %c0_i32_0 = arith.constant 0 : i32
    return %arg0, %arg1, %c0_i32 : i32, i32, i32
  }
  func.func @transform_1(%arg0: i32, %arg1: i32) -> (i32, i32, i32) {
    %c1_i32 = arith.constant 1 : i32
    %0 = arith.addi %arg1, %c1_i32 : i32
    %c8_i32 = arith.constant 8 : i32
    %1 = arith.muli %0, %c8_i32 : i32
    %c0_i32 = arith.constant 0 : i32
    %c0_i32_0 = arith.constant 0 : i32
    return %arg0, %1, %c0_i32 : i32, i32, i32
  }
  func.func @transform_2(%arg0: i32, %arg1: i32) -> (i32, i32, i32) {
    %c0_i32 = arith.constant 0 : i32
    %c0_i32_0 = arith.constant 0 : i32
    return %arg0, %arg1, %c0_i32 : i32, i32, i32
  }
  func.func @transform_3(%arg0: i32, %arg1: i32) -> (i32, i32, i32) {
    %c1_i32 = arith.constant 1 : i32
    %0 = arith.addi %arg1, %c1_i32 : i32
    %c8_i32 = arith.constant 8 : i32
    %1 = arith.muli %0, %c8_i32 : i32
    %c0_i32 = arith.constant 0 : i32
    %c0_i32_0 = arith.constant 0 : i32
    return %arg0, %1, %c0_i32 : i32, i32, i32
  }
  func.func @transform_4(%arg0: i32, %arg1: i32) -> (i32, i32, i32) {
    %c0_i32 = arith.constant 0 : i32
    %c0_i32_0 = arith.constant 0 : i32
    return %arg0, %arg1, %c0_i32 : i32, i32, i32
  }
  func.func @transform_5(%arg0: i32, %arg1: i32) -> (i32, i32, i32) {
    %c1_i32 = arith.constant 1 : i32
    %0 = arith.addi %arg1, %c1_i32 : i32
    %c8_i32 = arith.constant 8 : i32
    %1 = arith.muli %0, %c8_i32 : i32
    %c0_i32 = arith.constant 0 : i32
    %c0_i32_0 = arith.constant 0 : i32
    return %arg0, %1, %c0_i32 : i32, i32, i32
  }
  func.func @transform_6(%arg0: i32, %arg1: i32) -> (i32, i32, i32) {
    %c0_i32 = arith.constant 0 : i32
    %c0_i32_0 = arith.constant 0 : i32
    return %arg0, %arg1, %c0_i32 : i32, i32, i32
  }
  func.func @transform_7(%arg0: i32, %arg1: i32) -> (i32, i32, i32) {
    %c0_i32 = arith.constant 0 : i32
    %c0_i32_0 = arith.constant 0 : i32
    return %arg0, %arg1, %c0_i32 : i32, i32, i32
  }
  func.func @transform_8(%arg0: i32, %arg1: i32) -> (i32, i32, i32) {
    %c0_i32 = arith.constant 0 : i32
    %c0_i32_0 = arith.constant 0 : i32
    return %arg0, %arg1, %c0_i32 : i32, i32, i32
  }
  func.func @transform_9(%arg0: i32, %arg1: i32) -> (i32, i32, i32) {
    %c0_i32 = arith.constant 0 : i32
    %c0_i32_0 = arith.constant 0 : i32
    %c0_i32_1 = arith.constant 0 : i32
    %c0_i32_2 = arith.constant 0 : i32
    return %c0_i32, %c0_i32_0, %c0_i32_1 : i32, i32, i32
  }
  func.func @transform_10(%arg0: i32, %arg1: i32) -> (i32, i32) {
    %c0_i32 = arith.constant 0 : i32
    %c0_i32_0 = arith.constant 0 : i32
    %c0_i32_1 = arith.constant 0 : i32
    return %c0_i32, %c0_i32_0 : i32, i32
  }
  func.func @transform_11(%arg0: i32, %arg1: i32) -> (i32, i32, i32) {
    %c0_i32 = arith.constant 0 : i32
    %c0_i32_0 = arith.constant 0 : i32
    return %arg0, %arg1, %c0_i32 : i32, i32, i32
  }
}

</mosaic_0001>

<bundles_post_ra>
// kernel: tpu_custom_call.1
= control target key start
LH: loop header
LB: loop body
LE: loop exit
PB: predicated region body
PF: predicated region fallthrough
CT: control target
= control target key end

     0   :  { %s3087_s17 = smov 0   ;;  %s3089_s18 = smov 0   ;;  %s3456_s0 = inlined_call_operand.vmem [shape: f32[2,72,4], index: 0, kind: input, shape index: {}]   ;;  %s3457_s1 = inlined_call_operand.vmem [shape: f32[2,72,4], index: 1, kind: input, shape index: {}]   ;;  %s3458_s2 = inlined_call_operand.vmem [shape: f32[2,72,4], index: 2, kind: input, shape index: {}]   ;;  %s3459_s3 = inlined_call_operand.vmem [shape: f32[2,72,4], index: 3, kind: input, shape index: {}]   ;;  %s3460_s4 = inlined_call_operand.vmem [shape: f32[2,72,4], index: 4, kind: input, shape index: {}]   ;;  %s3461_s5 = inlined_call_operand.vmem [shape: f32[2,72,4], index: 5, kind: input, shape index: {}]   ;;  %s3462_s6 = inlined_call_operand.vmem [shape: f32[2,64,4], index: 6, kind: input, shape index: {}]   ;;  %s3463_s7 = inlined_call_operand.vmem [shape: f32[2,64,4], index: 7, kind: input, shape index: {}]   ;;  %s3464_s8 = inlined_call_operand.vmem [shape: f32[2,64,4], index: 8, kind: input, shape index: {}]   ;;  %s3465_s9 = inlined_call_operand.vmem [shape: f32[9,4,4], index: 9, kind: input, shape index: {}]   ;;  %s3466_s10 = inlined_call_operand.vmem [shape: f32[1,4], index: 10, kind: input, shape index: {}]   ;;  %s3467_s11 = inlined_call_operand.vmem [shape: f32[2,64,4], index: 11, kind: output, shape index: {}]  }
   0x1   :  { %s3091_s19 = smov 0  }
   0x2 LB: > { %s33_s20 = sadd.s32 1, %s3019_s18  ;;  %p2549_p0 = scmp.ge.s32.totalorder %s3023_s19, 1  ;;  %s3023_s19 = sphi %s3091_s19, %s21_s19   ;;  %s3019_s18 = sphi %s3089_s18, %s3469_s18   ;;  %s3015_s17 = sphi %s3087_s17, %s3468_s17  }
   0x3   : > { %p35_p1 = scmp.ge.s32.totalorder %s33_s20, 2  ;;  %p536_p2 = scmp.lt.s32.totalorder %s3023_s19, 3 }
   0x5   : > { %s3471_s20 = smov (%p35_p1, %s33_s20), 0  ;;  %p537_p3 = pnand %p2549_p0, %p536_p2 }
   0x6   : > { %v856_v0 = vld [vmem:[%s3465_s9] sm:$0xf] (!%p537_p3)  ;;  %vm882_vm0 = vcmask (!%p537_p3), 1043456   ;;  %v2625_v1 = vld [vmem:[%s3465_s9 + $0x1c] sm:$0xf] (!%p537_p3)  ;;  %v3025_v2 = vmov (!%p537_p3), 0.0  }
   0x7   : > { %540 = sbr.rel (%p537_p3) target bundleno = 346 (0x15a), region = 64  ;;  %2756 = vmatprep.subr.msk.mxu0 (!%p537_p3), %vm882_vm0, %v856_v0  ;;  %2840 = vmatprep.subr.mxu1 (!%p537_p3), %v3025_v2  ;;  %p676_p4 = scmp.lt.s32.totalorder (!%p537_p3), %s3015_s17, 1  ;;  %v2574_v3 = vld [vmem:[%s3465_s9 + $0x4] sm:$0xf] (!%p537_p3)  ;;  %vm3026_vm1 = vmmov (!%p537_p3), 0   ;;  %vm857_vm2 = vcmask (!%p537_p3), 31744  }
   0x8   : > { %2757 = vmatpush3.msk.msra.mxu0 (!%p537_p3), %vm882_vm0, %v856_v0  ;;  %2841 = vmatpush3.msk.msra.mxu1 (!%p537_p3), %vm882_vm0, %v2625_v1  ;;  %v2624_v8 = vld [vmem:[%s3465_s9 + $0x18] sm:$0xf] (!%p537_p3)  ;;  %v2584_v9 = vld [vmem:[%s3465_s9 + $0x8] sm:$0xf] (!%p537_p3)  ;;  %v2594_v20 = vld [vmem:[%s3465_s9 + $0xc] sm:$0xf] (!%p537_p3) }
   0x9   : > { %2842 = vmatprep.mubr.msk.f32.mxu1 (!%p537_p3), %vm3026_vm1, %v3025_v2  ;;  %2770 = vmatprep.subr.msk.mxu0 (!%p537_p3), %vm882_vm0, %v2574_v3  ;;  %v2642_v24 = vld [vmem:[%s3465_s9 + $0x20] sm:$0xf] (!%p537_p3)  ;;  %v2604_v27 = vld [vmem:[%s3465_s9 + $0x10] sm:$0xf] (!%p537_p3)  ;;  %v2614_v36 = vld [vmem:[%s3465_s9 + $0x14] sm:$0xf] (!%p537_p3) }
   0xa   : > { %2863 = vmatprep.subr.mxu1 (!%p537_p3), %v3025_v2  ;;  %v2652_v41 = vld [vmem:[%s3465_s9 + $0x1c] sm:$0xf] (!%p537_p3)  ;;  %v2651_v56 = vld [vmem:[%s3465_s9 + $0x18] sm:$0xf] (!%p537_p3)  ;;  %v2657_v60 = vld [vmem:[%s3465_s9 + $0x20] sm:$0xf] (!%p537_p3) }
   0xe   : > { %s3473_s17 = smov (!%p676_p4, %s3015_s17), 1 }
   0xf   : > { %s3125_s27 = smul.u32 72, %s3473_s17 }
  0x11   : > { %s3131_s30 = scalar_lea.vmem %s3456_s0, %s3125_s27  ;;  %s3137_s14 = scalar_lea.vmem %s3458_s2, %s3125_s27 }
  0x12   : > { %v801_v4 = vld [vmem:[%s3131_s30] sm:$0xff]  ;;  %v810_v5 = vld [vmem:[%s3137_s14 + $0x8] sm:$0xff]  ;;  %v803_v7 = vld [vmem:[%s3131_s30 + $0x10] sm:$0xff]  ;;  %s3218_s28 = scalar_lea.vmem %s3460_s4, %s3125_s27  ;;  %s3362_s13 = sadd.s32 64, %s3125_s27 }
  0x13   : > { %v802_v6 = vld [vmem:[%s3131_s30 + $0x8] sm:$0xff]  ;;  %2758 = vmatprep.mubr.msk.f32.mxu0 %vm857_vm2, %v801_v4  ;;  %2843 = vmatmul.mubr.msk.f32.vlgmr.msra.gmra.mrb[0].mxu1 %vm857_vm2, %v810_v5  ;;  %v811_v10 = vld [vmem:[%s3137_s14 + $0x10] sm:$0xff]  ;;  %v804_v11 = vld [vmem:[%s3131_s30 + $0x18] sm:$0xff]  ;;  %s698_s24 = scalar_lea.vmem %s3457_s1, %s3362_s13 }
  0x14   : > { %2759 = vmatmul.mubr.msk.f32.vlgmr.msra.gmra.mrb[0].mxu0 %vm857_vm2, %v802_v6  ;;  %2845 = vmatprep.mubr.msk.f32.mxu1 %vm3026_vm1, %v3025_v2  ;;  %v3159_v12 = vld [vmem:[%s3131_s30 + $0x20] sm:$0xff]  ;;  %v812_v13 = vld [vmem:[%s3137_s14 + $0x18] sm:$0xff]  ;;  %v3172_v14 = vld [vmem:[%s3131_s30 + $0x28] sm:$0xff] }
  0x15   : > { %2771 = vmatpush3.msk.msra.mxu0 %vm882_vm0, %v2574_v3  ;;  %2761 = vmatprep.mubr.msk.f32.mxu0 %vm857_vm2, %v803_v7  ;;  %v3175_v15 = vld [vmem:[%s3131_s30 + $0x30] sm:$0xff]  ;;  %v813_v16 = vld [vmem:[%s3137_s14 + $0x20] sm:$0xff]  ;;  %v3186_v17 = vld [vmem:[%s3131_s30 + $0x38] sm:$0xff]  ;;  %s758_s30 = scalar_lea.vmem %s3461_s5, %s3362_s13 }
  0x16   : > { %2864 = vmatpush3.msk.msra.mxu1 %vm882_vm0, %v2624_v8  ;;  %2784 = vmatprep.subr.msk.mxu0 %vm882_vm0, %v2584_v9  ;;  %v809_v18 = vld [vmem:[%s3137_s14] sm:$0xff]  ;;  %v814_v19 = vld [vmem:[%s3137_s14 + $0x28] sm:$0xff]  ;;  %v815_v21 = vld [vmem:[%s3137_s14 + $0x30] sm:$0xff] }
  0x17   : > { %2846 = vmatmul.mubr.msk.f32.gmra.mrb[2].mxu1 %vm857_vm2, %v811_v10  ;;  %2886 = vmatprep.subr.mxu1 %v3025_v2  ;;  %v816_v22 = vld [vmem:[%s3137_s14 + $0x38] sm:$0xff]  ;;  %v817_v23 = vld [vmem:[%s3218_s28] sm:$0xff]  ;;  %v818_v25 = vld [vmem:[%s3218_s28 + $0x8] sm:$0xff]  ;;  %s3254_s14 = sshll.u32 %s3473_s17, 6 }
  0x18   : > { %2762 = vmatmul.mubr.msk.f32.gmra.mrb[2].mxu0 %vm857_vm2, %v804_v11  ;;  %2848 = vmatprep.mubr.msk.f32.mxu1 %vm3026_vm1, %v3025_v2  ;;  %v819_v26 = vld [vmem:[%s3218_s28 + $0x10] sm:$0xff]  ;;  %v820_v28 = vld [vmem:[%s3218_s28 + $0x18] sm:$0xff]  ;;  %v821_v29 = vld [vmem:[%s3218_s28 + $0x20] sm:$0xff]  ;;  %s3267_s21 = scalar_lea.vmem %s3462_s6, %s3254_s14  ;;  %s3353_s12 = scalar_lea.vmem %s3464_s8, %s3254_s14 }
  0x19   : > { %2764 = vmatprep.mubr.msk.f32.mxu0 %vm857_vm2, %v3159_v12  ;;  %v822_v30 = vld [vmem:[%s3218_s28 + $0x28] sm:$0xff]  ;;  %v3259_v31 = vld [vmem:[%s3218_s28 + $0x30] sm:$0xff]  ;;  %v3275_v32 = vld [vmem:[%s3218_s28 + $0x38] sm:$0xff]  ;;  %s3316_s28 = scalar_lea.vmem %s3463_s7, %s3254_s14 }
  0x1a   : > { %v825_v33 = vld [vmem:[%s3267_s21] sm:$0xff]  ;;  %v826_v34 = vld [vmem:[%s3267_s21 + $0x8] sm:$0xff]  ;;  %v827_v35 = vld [vmem:[%s3267_s21 + $0x10] sm:$0xff] }
  0x1b   : > { %2849 = vmatmul.mubr.msk.f32.gmra.mrb[4].mxu1 %vm857_vm2, %v812_v13  ;;  %v828_v37 = vld [vmem:[%s3267_s21 + $0x18] sm:$0xff]  ;;  %v829_v38 = vld [vmem:[%s3267_s21 + $0x20] sm:$0xff]  ;;  %v830_v39 = vld [vmem:[%s3267_s21 + $0x28] sm:$0xff] }
  0x1c   : > { %2765 = vmatmul.mubr.msk.f32.gmra.mrb[4].mxu0 %vm857_vm2, %v3172_v14  ;;  %2851 = vmatprep.mubr.msk.f32.mxu1 %vm3026_vm1, %v3025_v2  ;;  %v831_v40 = vld [vmem:[%s3267_s21 + $0x30] sm:$0xff]  ;;  %v832_v42 = vld [vmem:[%s3267_s21 + $0x38] sm:$0xff]  ;;  %v833_v43 = vld [vmem:[%s3316_s28] sm:$0xff]  ;;  %s728_s21 = scalar_lea.vmem %s3459_s3, %s3362_s13 }
  0x1d   : > { %2767 = vmatprep.mubr.msk.f32.mxu0 %vm857_vm2, %v3175_v15  ;;  %v834_v44 = vld [vmem:[%s3316_s28 + $0x8] sm:$0xff]  ;;  %v835_v45 = vld [vmem:[%s3316_s28 + $0x10] sm:$0xff]  ;;  %v836_v46 = vld [vmem:[%s3316_s28 + $0x18] sm:$0xff] }
  0x1e   : > { %v837_v47 = vld [vmem:[%s3316_s28 + $0x20] sm:$0xff]  ;;  %v838_v48 = vld [vmem:[%s3316_s28 + $0x28] sm:$0xff]  ;;  %v839_v49 = vld [vmem:[%s3316_s28 + $0x30] sm:$0xff] }
  0x1f   : > { %2852 = vmatmul.mubr.msk.f32.gmra.mrb[6].mxu1 %vm857_vm2, %v813_v16  ;;  %v840_v50 = vld [vmem:[%s3316_s28 + $0x38] sm:$0xff]  ;;  %v841_v51 = vld [vmem:[%s3353_s12] sm:$0xff]  ;;  %v842_v52 = vld [vmem:[%s3353_s12 + $0x8] sm:$0xff] }
  0x20   : > { %2768 = vmatmul.mubr.msk.f32.gmra.mrb[6].mxu0 %vm857_vm2, %v3186_v17  ;;  %2854 = vmatprep.mubr.msk.f32.mxu1 %vm3026_vm1, %v3025_v2  ;;  %v843_v53 = vld [vmem:[%s3353_s12 + $0x10] sm:$0xff]  ;;  %v2063_v54 = vld [vmem:[%s728_s21] sm:$0xff]  ;;  %v844_v55 = vld [vmem:[%s3353_s12 + $0x18] sm:$0xff]  ;;  %s799_s21 = scalar_lea.vmem %s3467_s11, %s3254_s14 }
  0x21   : > { %2772 = vmatprep.mubr.msk.f32.mxu0 %vm857_vm2, %v809_v18  ;;  %v845_v57 = vld [vmem:[%s3353_s12 + $0x20] sm:$0xff]  ;;  %v846_v59 = vld [vmem:[%s3353_s12 + $0x28] sm:$0xff]  ;;  %v847_v61 = vld [vmem:[%s3353_s12 + $0x30] sm:$0xff] }
  0x22   : > { %v2061_v58 = vld [vmem:[%s698_s24] sm:$0xff]  ;;  %v848_v63 = vld [vmem:[%s3353_s12 + $0x38] sm:$0xff] }
  0x23   : > { %2855 = vmatmul.mubr.msk.f32.gmra.mrb[8].mxu1 %vm857_vm2, %v814_v19  ;;  %v2217_v62 = vld [vmem:[%s758_s30] sm:$0xff] }
  0x24   : > { %2773 = vmatmul.mubr.msk.f32.vlgmr.msra.gmra.mrb[0].mxu0 %vm857_vm2, %v810_v5  ;;  %2857 = vmatprep.mubr.msk.f32.mxu1 %vm3026_vm1, %v3025_v2 }
  0x25   : > { %2785 = vmatpush3.msk.msra.mxu0 %vm882_vm0, %v2584_v9  ;;  %2775 = vmatprep.mubr.msk.f32.mxu0 %vm857_vm2, %v811_v10 }
  0x26   : > { %2798 = vmatprep.subr.msk.mxu0 %vm882_vm0, %v2594_v20 }
  0x27   : > { %2858 = vmatmul.mubr.msk.f32.gmra.mrb[10].mxu1 %vm857_vm2, %v815_v21 }
  0x28   : > { %2776 = vmatmul.mubr.msk.f32.gmra.mrb[2].mxu0 %vm857_vm2, %v812_v13  ;;  %2860 = vmatprep.mubr.msk.f32.mxu1 %vm3026_vm1, %v3025_v2 }
  0x29   : > { %2778 = vmatprep.mubr.msk.f32.mxu0 %vm857_vm2, %v813_v16 }
  0x2b   : > { %2861 = vmatmul.mubr.msk.f32.gmra.mrb[12].mxu1 %vm857_vm2, %v816_v22 }
  0x2c   : > { %2779 = vmatmul.mubr.msk.f32.gmra.mrb[4].mxu0 %vm857_vm2, %v814_v19  ;;  %2865 = vmatprep.mubr.msk.f32.mxu1 %vm3026_vm1, %v3025_v2 }
  0x2d   : > { %2781 = vmatprep.mubr.msk.f32.mxu0 %vm857_vm2, %v815_v21 }
  0x2f   : > { %2866 = vmatmul.mubr.msk.f32.vlgmr.msra.gmra.mrb[14].mxu1 %vm857_vm2, %v802_v6 }
  0x30   : > { %2782 = vmatmul.mubr.msk.f32.gmra.mrb[6].mxu0 %vm857_vm2, %v816_v22  ;;  %2868 = vmatprep.mubr.msk.f32.mxu1 %vm3026_vm1, %v3025_v2 }
  0x31   : > { %2786 = vmatprep.mubr.msk.f32.mxu0 %vm857_vm2, %v817_v23  ;;  %2887 = vmatpush3.msk.msra.mxu1 %vm882_vm0, %v2642_v24 }
  0x32   : > { %2909 = vmatprep.subr.mxu1 %v3025_v2 }
  0x33   : > { %2869 = vmatmul.mubr.msk.f32.gmra.mrb[16].mxu1 %vm857_vm2, %v803_v7 }
  0x34   : > { %2787 = vmatmul.mubr.msk.f32.vlgmr.msra.gmra.mrb[0].mxu0 %vm857_vm2, %v818_v25  ;;  %2871 = vmatprep.mubr.msk.f32.mxu1 %vm3026_vm1, %v3025_v2 }
  0x35   : > { %2799 = vmatpush3.msk.msra.mxu0 %vm882_vm0, %v2594_v20  ;;  %2789 = vmatprep.mubr.msk.f32.mxu0 %vm857_vm2, %v819_v26 }
  0x36   : > { %2812 = vmatprep.subr.msk.mxu0 %vm882_vm0, %v2604_v27 }
  0x37   : > { %2872 = vmatmul.mubr.msk.f32.gmra.mrb[18].mxu1 %vm857_vm2, %v804_v11 }
  0x38   : > { %2790 = vmatmul.mubr.msk.f32.gmra.mrb[2].mxu0 %vm857_vm2, %v820_v28  ;;  %2874 = vmatprep.mubr.msk.f32.mxu1 %vm3026_vm1, %v3025_v2 }
  0x39   : > { %2792 = vmatprep.mubr.msk.f32.mxu0 %vm857_vm2, %v821_v29 }
  0x3b   : > { %2875 = vmatmul.mubr.msk.f32.gmra.mrb[20].mxu1 %vm857_vm2, %v3159_v12 }
  0x3c   : > { %2793 = vmatmul.mubr.msk.f32.gmra.mrb[4].mxu0 %vm857_vm2, %v822_v30  ;;  %2877 = vmatprep.mubr.msk.f32.mxu1 %vm3026_vm1, %v3025_v2 }
  0x3d   : > { %2795 = vmatprep.mubr.msk.f32.mxu0 %vm857_vm2, %v3259_v31 }
  0x3f   : > { %2878 = vmatmul.mubr.msk.f32.gmra.mrb[22].mxu1 %vm857_vm2, %v3172_v14 }
  0x40   : > { %2796 = vmatmul.mubr.msk.f32.gmra.mrb[6].mxu0 %vm857_vm2, %v3275_v32  ;;  %2880 = vmatprep.mubr.msk.f32.mxu1 %vm3026_vm1, %v3025_v2 }
  0x41   : > { %2800 = vmatprep.mubr.msk.f32.mxu0 %vm857_vm2, %v825_v33 }
  0x43   : > { %2881 = vmatmul.mubr.msk.f32.gmra.mrb[24].mxu1 %vm857_vm2, %v3175_v15 }
  0x44   : > { %2801 = vmatmul.mubr.msk.f32.vlgmr.msra.gmra.mrb[0].mxu0 %vm857_vm2, %v826_v34  ;;  %2883 = vmatprep.mubr.msk.f32.mxu1 %vm3026_vm1, %v3025_v2 }
  0x45   : > { %2813 = vmatpush3.msk.msra.mxu0 %vm882_vm0, %v2604_v27  ;;  %2803 = vmatprep.mubr.msk.f32.mxu0 %vm857_vm2, %v827_v35 }
  0x46   : > { %2826 = vmatprep.subr.msk.mxu0 %vm882_vm0, %v2614_v36 }
  0x47   : > { %2884 = vmatmul.mubr.msk.f32.gmra.mrb[26].mxu1 %vm857_vm2, %v3186_v17 }
  0x48   : > { %2804 = vmatmul.mubr.msk.f32.gmra.mrb[2].mxu0 %vm857_vm2, %v828_v37  ;;  %2888 = vmatprep.mubr.msk.f32.mxu1 %vm3026_vm1, %v3025_v2 }
  0x49   : > { %2806 = vmatprep.mubr.msk.f32.mxu0 %vm857_vm2, %v829_v38 }
  0x4b   : > { %2889 = vmatmul.mubr.msk.f32.vlgmr.msra.gmra.mrb[28].mxu1 %vm857_vm2, %v818_v25 }
  0x4c   : > { %2807 = vmatmul.mubr.msk.f32.gmra.mrb[4].mxu0 %vm857_vm2, %v830_v39  ;;  %2891 = vmatprep.mubr.msk.f32.mxu1 %vm3026_vm1, %v3025_v2 }
  0x4d   : > { %2809 = vmatprep.mubr.msk.f32.mxu0 %vm857_vm2, %v831_v40  ;;  %2910 = vmatpush3.msk.msra.mxu1 %vm882_vm0, %v2652_v41 }
  0x4e   : > { %2914 = vmatprep.subr.mxu1 %v3025_v2 }
  0x4f   : > { %2892 = vmatmul.mubr.msk.f32.gmra.mrb[30].mxu1 %vm857_vm2, %v819_v26 }
  0x50   : > { %2810 = vmatmul.mubr.msk.f32.gmra.mrb[6].mxu0 %vm857_vm2, %v832_v42  ;;  %2894 = vmatprep.mubr.msk.f32.mxu1 %vm3026_vm1, %v3025_v2 }
  0x51   : > { %2814 = vmatprep.mubr.msk.f32.mxu0 %vm857_vm2, %v833_v43 }
  0x53   : > { %2895 = vmatmul.mubr.msk.f32.gmra.mrb[32].mxu1 %vm857_vm2, %v820_v28 }
  0x54   : > { %2815 = vmatmul.mubr.msk.f32.vlgmr.msra.gmra.mrb[0].mxu0 %vm857_vm2, %v834_v44  ;;  %2897 = vmatprep.mubr.msk.f32.mxu1 %vm3026_vm1, %v3025_v2 }
  0x55   : > { %2827 = vmatpush3.msk.msra.mxu0 %vm882_vm0, %v2614_v36  ;;  %2817 = vmatprep.mubr.msk.f32.mxu0 %vm857_vm2, %v835_v45 }
  0x57   : > { %2898 = vmatmul.mubr.msk.f32.gmra.mrb[34].mxu1 %vm857_vm2, %v821_v29 }
  0x58   : > { %2818 = vmatmul.mubr.msk.f32.gmra.mrb[2].mxu0 %vm857_vm2, %v836_v46  ;;  %2900 = vmatprep.mubr.msk.f32.mxu1 %vm3026_vm1, %v3025_v2 }
  0x59   : > { %2820 = vmatprep.mubr.msk.f32.mxu0 %vm857_vm2, %v837_v47 }
  0x5b   : > { %2901 = vmatmul.mubr.msk.f32.gmra.mrb[36].mxu1 %vm857_vm2, %v822_v30 }
  0x5c   : > { %2821 = vmatmul.mubr.msk.f32.gmra.mrb[4].mxu0 %vm857_vm2, %v838_v48  ;;  %2903 = vmatprep.mubr.msk.f32.mxu1 %vm3026_vm1, %v3025_v2 }
  0x5d   : > { %2823 = vmatprep.mubr.msk.f32.mxu0 %vm857_vm2, %v839_v49 }
  0x5f   : > { %2904 = vmatmul.mubr.msk.f32.gmra.mrb[38].mxu1 %vm857_vm2, %v3259_v31 }
  0x60   : > { %2824 = vmatmul.mubr.msk.f32.gmra.mrb[6].mxu0 %vm857_vm2, %v840_v50  ;;  %2906 = vmatprep.mubr.msk.f32.mxu1 %vm3026_vm1, %v3025_v2 }
  0x61   : > { %2828 = vmatprep.mubr.msk.f32.mxu0 %vm857_vm2, %v841_v51 }
  0x63   : > { %2907 = vmatmul.mubr.msk.f32.gmra.mrb[40].mxu1 %vm857_vm2, %v3275_v32 }
  0x64   : > { %2829 = vmatmul.mubr.msk.f32.vlgmr.msra.gmra.mrb[0].mxu0 %vm857_vm2, %v842_v52  ;;  %2911 = vmatprep.mubr.msk.f32.mxu1 %vm3026_vm1, %v3025_v2 }
  0x65   : > { %2831 = vmatprep.mubr.msk.f32.mxu0 %vm857_vm2, %v843_v53  ;;  %v2564_v53 = vld [vmem:[%s3466_s10] ss:$0 sm:$0xff] }
  0x67   : > { %2912 = vmatmul.mubr.msk.f32.vlgmr.msra.gmra.mrb[42].mxu1 %vm857_vm2, %v2063_v54 }
  0x68   : > { %2832 = vmatmul.mubr.msk.f32.gmra.mrb[2].mxu0 %vm857_vm2, %v844_v55  ;;  %2915 = vmatpush3.msk.msra.mxu1 %vm882_vm0, %v2651_v56 }
  0x69   : > { %2834 = vmatprep.mubr.msk.f32.mxu0 %vm857_vm2, %v845_v57  ;;  %2916 = vmatprep.mubr.msk.f32.mxu1 %vm3026_vm1, %v3025_v2 }
  0x6a   : > { %2919 = vmatprep.subr.mxu1 %v3025_v2 }
  0x6b   : > { %2917 = vmatmul.mubr.msk.f32.vlgmr.msra.gmra.mrb[44].mxu1 %vm857_vm2, %v2061_v58 }
  0x6c   : > { %2835 = vmatmul.mubr.msk.f32.gmra.mrb[4].mxu0 %vm857_vm2, %v846_v59  ;;  %2920 = vmatpush3.msk.msra.mxu1 %vm882_vm0, %v2657_v60 }
  0x6d   : > { %2837 = vmatprep.mubr.msk.f32.mxu0 %vm857_vm2, %v847_v61  ;;  %2921 = vmatprep.mubr.msk.f32.mxu1 %vm3026_vm1, %v3025_v2 }
  0x6f   : > { %2922 = vmatmul.mubr.msk.f32.vlgmr.msra.gmra.mrb[46].mxu1 %vm857_vm2, %v2217_v62 }
  0x70   : > { %2838 = vmatmul.mubr.msk.f32.gmra.mrb[6].mxu0 %vm857_vm2, %v848_v63 }
  0xe6   : > { %v1797_v0 = vpop.f32.mrb[0].mxu1 }
  0xe7   : > { %v2844_v1 = vpop.f32.mrb[1].mxu1 }
  0xea   : > { %v1802_v3 = vpop.f32.mrb[2].mxu1 }
  0xeb   : > { %v2847_v4 = vpop.f32.mrb[3].mxu1 }
  0xee   : > { %v1807_v5 = vpop.f32.mrb[4].mxu1 }
  0xef   : > { %v2850_v6 = vpop.f32.mrb[5].mxu1 }
  0xf2   : > { %v1812_v7 = vpop.f32.mrb[6].mxu1 }
  0xf3   : > { %v2853_v8 = vpop.f32.mrb[7].mxu1 }
  0xf6   : > { %v1817_v9 = vpop.f32.mrb[8].mxu1 }
  0xf7   : > { %v2856_v10 = vpop.f32.mrb[9].mxu1 }
  0xfa   : > { %v1822_v11 = vpop.f32.mrb[10].mxu1 }
  0xfb   : > { %v2859_v12 = vpop.f32.mrb[11].mxu1 }
  0xfe   : > { %v1827_v13 = vpop.f32.mrb[12].mxu1 }
  0xff   : > { %v2862_v14 = vpop.f32.mrb[13].mxu1 }
 0x102   : > { %v1900_v15 = vpop.f32.mrb[14].mxu1 }
 0x103   : > { %v1901_v2 = vadd.f32 %v1900_v15, %v1797_v0  ;;  %v2867_v16 = vpop.f32.mrb[15].mxu1 }
 0x106   : > { %v1905_v17 = vpop.f32.mrb[16].mxu1 }
 0x107   : > { %v1906_v18 = vadd.f32 %v1905_v17, %v1802_v3  ;;  %v2870_v19 = vpop.f32.mrb[17].mxu1 }
 0x10a   : > { %v1910_v20 = vpop.f32.mrb[18].mxu1 }
 0x10b   : > { %v1911_v21 = vadd.f32 %v1910_v20, %v1807_v5  ;;  %v2873_v22 = vpop.f32.mrb[19].mxu1 }
 0x10e   : > { %v1915_v23 = vpop.f32.mrb[20].mxu1 }
 0x10f   : > { %v1916_v24 = vadd.f32 %v1915_v23, %v1812_v7  ;;  %v2876_v25 = vpop.f32.mrb[21].mxu1 }
 0x112   : > { %v1920_v26 = vpop.f32.mrb[22].mxu1 }
 0x113   : > { %v1921_v27 = vadd.f32 %v1920_v26, %v1817_v9  ;;  %v2879_v28 = vpop.f32.mrb[23].mxu1 }
 0x116   : > { %v1925_v29 = vpop.f32.mrb[24].mxu1 }
 0x117   : > { %v1926_v30 = vadd.f32 %v1925_v29, %v1822_v11  ;;  %v2882_v31 = vpop.f32.mrb[25].mxu1 }
 0x11a   : > { %v1930_v32 = vpop.f32.mrb[26].mxu1 }
 0x11b   : > { %v1931_v33 = vadd.f32 %v1930_v32, %v1827_v13  ;;  %v2885_v34 = vpop.f32.mrb[27].mxu1 }
 0x11e   : > { %v2005_v35 = vpop.f32.mrb[28].mxu1 }
 0x11f   : > { %v2039_v36 = vadd.f32 %v2005_v35, %v1901_v2  ;;  %v2890_v37 = vpop.f32.mrb[29].mxu1 }
 0x122   : > { %v2010_v38 = vpop.f32.mrb[30].mxu1 }
 0x123   : > { %v2040_v39 = vadd.f32 %v2010_v38, %v1906_v18  ;;  %v2893_v40 = vpop.f32.mrb[31].mxu1 }
 0x126   : > { %v2015_v41 = vpop.f32.mrb[32].mxu1 }
 0x127   : > { %v2041_v42 = vadd.f32 %v2015_v41, %v1911_v21  ;;  %v2896_v43 = vpop.f32.mrb[33].mxu1 }
 0x12a   : > { %v2020_v44 = vpop.f32.mrb[34].mxu1 }
 0x12b   : > { %v2042_v45 = vadd.f32 %v2020_v44, %v1916_v24  ;;  %v2899_v46 = vpop.f32.mrb[35].mxu1 }
 0x12e   : > { %v2025_v47 = vpop.f32.mrb[36].mxu1 }
 0x12f   : > { %v2043_v48 = vadd.f32 %v2025_v47, %v1921_v27  ;;  %v2902_v49 = vpop.f32.mrb[37].mxu1 }
 0x132   : > { %v2030_v50 = vpop.f32.mrb[38].mxu1 }
 0x133   : > { %v2044_v51 = vadd.f32 %v2030_v50, %v1926_v30  ;;  %v2905_v52 = vpop.f32.mrb[39].mxu1 }
 0x136   : > { %v2035_v54 = vpop.f32.mrb[40].mxu1 }
 0x137   : > { %v2045_v55 = vadd.f32 %v2035_v54, %v1931_v33  ;;  %v2830_v56 = vpop.f32.mrb[0].mxu0  ;;  %v2908_v57 = vpop.f32.mrb[41].mxu1 }
 0x138   : > { %v2924_v58 = vadd.f32 %v2830_v56, %v2564_v53  ;;  %v1662_v59 = vpop.f32.mrb[1].mxu0 }
 0x139   : > { %v2925_v60 = vadd.f32 %v2564_v53, %v1662_v59 }
 0x13a   : > { %1710 = vst.msk [vmem:[#allocation2 + $0x8] sm:$0xff] %vm857_vm2, %v2924_v58  ;;  %v2137_v61 = vpop.f32.mrb[42].mxu1 }
 0x13b   : > { %1709 = vst.msk [vmem:[#allocation2] sm:$0xff] %vm857_vm2, %v2925_v60  ;;  %v2833_v62 = vpop.f32.mrb[2].mxu0  ;;  %v2913_v63 = vpop.f32.mrb[43].mxu1 }
 0x13c   : > { %v2926_v0 = vadd.f32 %v2833_v62, %v2564_v53  ;;  %v1672_v1 = vpop.f32.mrb[3].mxu0 }
 0x13d   : > { %v2927_v3 = vadd.f32 %v2564_v53, %v1672_v1 }
 0x13e   : > { %1712 = vst.msk [vmem:[#allocation2 + $0x18] sm:$0xff] %vm857_vm2, %v2926_v0  ;;  %v2213_v4 = vpop.f32.mrb[44].mxu1 }
 0x13f   : > { %1711 = vst.msk [vmem:[#allocation2 + $0x10] sm:$0xff] %vm857_vm2, %v2927_v3  ;;  %v2836_v5 = vpop.f32.mrb[4].mxu0  ;;  %v2214_v6 = vadd.f32 %v2213_v4, %v2137_v61  ;;  %v2918_v7 = vpop.f32.mrb[45].mxu1 }
 0x140   : > { %v2928_v8 = vadd.f32 %v2836_v5, %v2564_v53  ;;  %v1682_v9 = vpop.f32.mrb[5].mxu0 }
 0x141   : > { %v1718_v10 = vld [vmem:[#allocation2 + $0x8] sm:$0xff]  ;;  %v2929_v11 = vadd.f32 %v2564_v53, %v1682_v9 }
 0x142   : > { %v2047_v12 = vadd.f32 %v2040_v39, %v1718_v10  ;;  %v1717_v13 = vld [vmem:[#allocation2] sm:$0xff]  ;;  %1714 = vst.msk [vmem:[#allocation2 + $0x28] sm:$0xff] %vm857_vm2, %v2928_v8  ;;  %v2291_v14 = vpop.f32.mrb[46].mxu1 }
 0x143   : > { %v2046_v15 = vadd.f32 %v2039_v36, %v1717_v13  ;;  %1713 = vst.msk [vmem:[#allocation2 + $0x20] sm:$0xff] %vm857_vm2, %v2929_v11  ;;  %v2839_v2 = vpop.f32.mrb[6].mxu0  ;;  %v2295_v16 = vadd.f32 %v2291_v14, %v2214_v6  ;;  %v2923_v17 = vpop.f32.mrb[47].mxu1 }
 0x144   : > { %2054 = vst.msk [vmem:[#allocation2 + $0x8] sm:$0xff] %vm857_vm2, %v2047_v12  ;;  %v2930_v18 = vadd.f32 %v2839_v2, %v2564_v53  ;;  %v1692_v19 = vpop.f32.mrb[7].mxu0 }
 0x145   : > { %2053 = vst.msk [vmem:[#allocation2] sm:$0xff] %vm857_vm2, %v2046_v15  ;;  %v1720_v20 = vld [vmem:[#allocation2 + $0x18] sm:$0xff]  ;;  %v2931_v21 = vadd.f32 %v2564_v53, %v1692_v19 }
 0x146   : > { %v2049_v22 = vadd.f32 %v2042_v45, %v1720_v20  ;;  %v1719_v23 = vld [vmem:[#allocation2 + $0x10] sm:$0xff]  ;;  %1716 = vst.msk [vmem:[#allocation2 + $0x38] sm:$0xff] %vm857_vm2, %v2930_v18 }
 0x147   : > { %v2048_v24 = vadd.f32 %v2041_v42, %v1719_v23  ;;  %1715 = vst.msk [vmem:[#allocation2 + $0x30] sm:$0xff] %vm857_vm2, %v2931_v21 }
 0x148   : > { %2056 = vst.msk [vmem:[#allocation2 + $0x18] sm:$0xff] %vm857_vm2, %v2049_v22 }
 0x149   : > { %2055 = vst.msk [vmem:[#allocation2 + $0x10] sm:$0xff] %vm857_vm2, %v2048_v24  ;;  %v1722_v25 = vld [vmem:[#allocation2 + $0x28] sm:$0xff] }
 0x14a   : > { %v2051_v26 = vadd.f32 %v2044_v51, %v1722_v25  ;;  %v1721_v27 = vld [vmem:[#allocation2 + $0x20] sm:$0xff] }
 0x14b   : > { %v2299_v28 = vld [vmem:[#allocation2 + $0x8] sm:$0xff]  ;;  %v2050_v29 = vadd.f32 %v2043_v48, %v1721_v27 }
 0x14c   : > { %2307 = vst.msk [vmem:[%s799_s21 + $0x8] sm:$0xff] %vm857_vm2, %v2299_v28  ;;  %v2298_v30 = vld [vmem:[#allocation2] sm:$0xff]  ;;  %2058 = vst.msk [vmem:[#allocation2 + $0x28] sm:$0xff] %vm857_vm2, %v2051_v26 }
 0x14d   : > { %2306 = vst.msk [vmem:[%s799_s21] sm:$0xff] %vm857_vm2, %v2298_v30  ;;  %2057 = vst.msk [vmem:[#allocation2 + $0x20] sm:$0xff] %vm857_vm2, %v2050_v29  ;;  %v2060_v31 = vld [vmem:[#allocation2 + $0x38] sm:$0xff] }
 0x14e   : > { %v1723_v32 = vld [vmem:[#allocation2 + $0x30] sm:$0xff]  ;;  %v2296_v33 = vadd.f32 %v2295_v16, %v2060_v31 }
 0x14f   : > { %v2301_v34 = vld [vmem:[#allocation2 + $0x18] sm:$0xff]  ;;  %v2052_v35 = vadd.f32 %v2045_v55, %v1723_v32 }
 0x150   : > { %2309 = vst.msk [vmem:[%s799_s21 + $0x18] sm:$0xff] %vm857_vm2, %v2301_v34  ;;  %v2300_v36 = vld [vmem:[#allocation2 + $0x10] sm:$0xff]  ;;  %2297 = vst.msk [vmem:[#allocation2 + $0x38] sm:$0xff] %vm857_vm2, %v2296_v33 }
 0x151   : > { %2308 = vst.msk [vmem:[%s799_s21 + $0x10] sm:$0xff] %vm857_vm2, %v2300_v36  ;;  %2059 = vst.msk [vmem:[#allocation2 + $0x30] sm:$0xff] %vm857_vm2, %v2052_v35 }
 0x153   : > { %v2303_v37 = vld [vmem:[#allocation2 + $0x28] sm:$0xff] }
 0x154   : > { %2311 = vst.msk [vmem:[%s799_s21 + $0x28] sm:$0xff] %vm857_vm2, %v2303_v37  ;;  %v2302_v38 = vld [vmem:[#allocation2 + $0x20] sm:$0xff] }
 0x155   : > { %2310 = vst.msk [vmem:[%s799_s21 + $0x20] sm:$0xff] %vm857_vm2, %v2302_v38 }
 0x157   : > { %v2305_v39 = vld [vmem:[#allocation2 + $0x38] sm:$0xff] }
 0x158   : > { %v2304_v40 = vld [vmem:[#allocation2 + $0x30] sm:$0xff]  ;;  %2313 = vst.msk [vmem:[%s799_s21 + $0x38] sm:$0xff] %vm857_vm2, %v2305_v39 }
 0x159   : > { %2312 = vst.msk [vmem:[%s799_s21 + $0x30] sm:$0xff] %vm857_vm2, %v2304_v40 }
 0x15a PF: > { %s21_s19 = sadd.s32 1, %s3023_s19   ;;  %s3468_s17 = smov %s3019_s18 }
 0x15b   : > { %p18_p5 = scmp.ge.s32.totalorder %s21_s19, 4   ;;  %s3469_s18 = smov %s3471_s20 }
 0x15d   :  { %20 = sbr.rel (!%p18_p5) target bundleno = 2 (0x2), region = 126 }

</bundles_post_ra>
